<compile_context>
chip_gen: v6e
topology: v6e:2x2x1
jax: 0.10.0
libtpu: 0.0.40
codegen_flags: <defaults>
</compile_context>

<pallas_src>
import numpy as np
import jax
import jax.numpy as jnp
from jax.experimental import pallas as pl
from jax.experimental.pallas import tpu as pltpu

NEG_SLOPE = 0.2          # GATConv default leaky_relu slope
N_NODES = 20             # forced by the module: inner dim of edge_index.t() mm is 20
N_EDGES = 20             # == num_nodes (edge_index[0] has length num_nodes)
C_IN, C1, C2 = 10, 8, 2

# Static slab layout (all row offsets are sublane(8)-aligned, lane offsets 0).
ROW_GT = 0               # (N, 2E)   [g_i^T | g_j^T] one-hot gather matrix
ROW_EF = 24              # (20, N)   edge_index matrix cast to f32
ROW_W1 = 48              # (C1+2, C_IN)  augmented-transposed layer-1 weights
ROW_W2 = 64              # (C2+2, C1)    augmented-transposed layer-2 weights
SLAB_SHAPE = (68, 2 * N_EDGES)


def _gat_layer_T(hT, w_aug_T, GT, Ef, c_out):
    """One GATConv layer in transposed (feature-major) layout.

    hT      : (C_in, N)     transposed node features
    w_aug_T : (c_out+2, C_in)  rows 0..c_out-1 = W^T, rows c_out/c_out+1 = node-score rows
    GT      : (N, 2E)       [g_i^T | g_j^T] one-hot gather matrix
    Ef      : (20, N)       edge_index as f32 (aggregation operand)
    returns : (c_out, N)
    """
    E = N_EDGES
    # [h | node_scores]^T in one matmul (scores folded into the weights).
    haugT = jnp.dot(w_aug_T, hT, preferred_element_type=jnp.float32)      # (c_out+2, N)
    # Fused src/dst gather: columns 0:E gathered by edge_index[0], E:2E by edge_index[1].
    gath = jnp.dot(haugT, GT, preferred_element_type=jnp.float32)         # (c_out+2, 2E)

    x_jT = gath[0:c_out, E:2 * E]                                         # (c_out, E)
    s_i = gath[c_out:c_out + 1, 0:E]                                      # (1, E)
    s_j = gath[c_out + 1:c_out + 2, E:2 * E]                              # (1, E)

    # alpha = softmax(leaky_relu(s_i + s_j)) over all edges (dim 0 in the ref).
    a = s_i + s_j
    a = jnp.where(a > 0, a, NEG_SLOPE * a)
    a = a - jnp.max(a, axis=-1, keepdims=True)
    e = jnp.exp(a)
    alpha = e / jnp.sum(e, axis=-1, keepdims=True)                        # (1, E)

    # out^T = (alpha-scaled x_j)^T @ edge_index  (== (edge_index.t() @ (alpha*x_j))^T)
    return jnp.dot(x_jT * alpha, Ef, preferred_element_type=jnp.float32)  # (c_out, N)


def gat_kernel(p_ref, xT_ref, out_ref):
    GT = p_ref[ROW_GT:ROW_GT + N_NODES, 0:2 * N_EDGES]       # (N, 2E)
    Ef = p_ref[ROW_EF:ROW_EF + 20, 0:N_NODES]                # (20, N)
    w1T = p_ref[ROW_W1:ROW_W1 + C1 + 2, 0:C_IN]              # (C1+2, C_IN)
    w2T = p_ref[ROW_W2:ROW_W2 + C2 + 2, 0:C1]                # (C2+2, C1)
    xT = xT_ref[...]                                         # (C_IN, N)

    h1T = _gat_layer_T(xT, w1T, GT, Ef, C1)                  # (C1, N)
    h1T = jnp.maximum(h1T, jnp.float32(0.0))                 # F.relu
    h2T = _gat_layer_T(h1T, w2T, GT, Ef, C2)                 # (C2, N)

    # log_softmax over classes (= axis 0 in transposed layout)
    m = jnp.max(h2T, axis=0, keepdims=True)
    z = h2T - m
    lse = jnp.log(jnp.sum(jnp.exp(z), axis=0, keepdims=True))
    out_ref[...] = z - lse


@jax.jit
def gat_forward(static_slab, x):
    xT = x.T                                                 # (C_IN, N)
    out_t = pl.pallas_call(
        gat_kernel,
        out_shape=jax.ShapeDtypeStruct((C2, N_NODES), jnp.float32),
        in_specs=[pl.BlockSpec(memory_space=pltpu.MemorySpace.VMEM),
                  pl.BlockSpec(memory_space=pltpu.MemorySpace.VMEM)],
        out_specs=pl.BlockSpec(memory_space=pltpu.MemorySpace.VMEM),
    )(static_slab, xT)
    return out_t.T                                           # (N, 2)


def build_static_slab(w1, att1, w2, att2, num_nodes=N_NODES):
    """Pack edge-structure constants + attention-augmented weights into one slab."""
    # edge_index exactly as the torch module builds it: (20, num_nodes) int
    base = np.repeat(np.arange(10, dtype=np.int64).reshape(10, 1), num_nodes, axis=1)
    edge = np.concatenate([base, (base + 10) % 10], axis=0)              # (20, N)
    ei0, ei1 = edge[0], edge[1]                                          # (N,), (N,)

    node_ids = np.arange(num_nodes)[:, None]
    g_i_T = (node_ids == ei0[None, :]).astype(np.float32)                # (N, E)
    g_j_T = (node_ids == ei1[None, :]).astype(np.float32)                # (N, E)
    GT_cat = np.concatenate([g_i_T, g_j_T], axis=1)                      # (N, 2E)
    edge_f = edge.astype(np.float32)                                     # (20, N)

    def aug_T(w, att):
        w = np.asarray(w, np.float32)
        att = np.asarray(att, np.float32)
        c = w.shape[1]
        A = np.stack([att[0, :c], att[0, c:]], axis=1)                   # (c, 2)
        return np.concatenate([w, w @ A], axis=1).T                      # (c+2, C_in)

    w1aT = aug_T(w1, att1)                                               # (10, 10)
    w2aT = aug_T(w2, att2)                                               # (4, 8)

    slab = np.zeros(SLAB_SHAPE, np.float32)
    slab[ROW_GT:ROW_GT + num_nodes, 0:2 * N_EDGES] = GT_cat
    slab[ROW_EF:ROW_EF + 20, 0:num_nodes] = edge_f
    slab[ROW_W1:ROW_W1 + C1 + 2, 0:C_IN] = w1aT
    slab[ROW_W2:ROW_W2 + C2 + 2, 0:C1] = w2aT
    return jnp.asarray(slab)


# ----- plain-JAX reference (mirrors the torch code literally) -----
def _gatconv_ref(x, edge, w, att):
    h = x @ w
    c = w.shape[1]
    xi = h[edge[0]]
    xj = h[edge[1]]
    a = jnp.sum(xi * att[:, :c], -1) + jnp.sum(xj * att[:, c:], -1)
    a = jnp.where(a > 0, a, NEG_SLOPE * a)
    a = jax.nn.softmax(a, axis=0)
    return edge.T.astype(jnp.float32) @ (a[:, None] * xj)


def _gat_ref(x, edge, w1, a1, w2, a2):
    h = jax.nn.relu(_gatconv_ref(x, edge, w1, a1))
    h = _gatconv_ref(h, edge, w2, a2)
    return jax.nn.log_softmax(h, axis=-1)


if __name__ == "__main__":
    num_nodes = N_NODES

    key = jax.random.PRNGKey(0)
    k_x, k_w1, k_a1, k_w2, k_a2 = jax.random.split(key, 5)

    def xavier(k, shape, fan_in, fan_out):
        limit = float(np.sqrt(6.0 / (fan_in + fan_out)))
        return jax.random.uniform(k, shape, jnp.float32, -limit, limit)

    x = jax.random.normal(k_x, (num_nodes, C_IN), jnp.float32)
    w1 = xavier(k_w1, (C_IN, C1), C_IN, C1)        # GATConv(10 -> 8), heads=1
    att1 = xavier(k_a1, (1, 2 * C1), 1, 2 * C1)    # (1, heads, 2*8) flattened
    w2 = xavier(k_w2, (C1, C2), C1, C2)            # GATConv(8 -> 2), heads=1
    att2 = xavier(k_a2, (1, 2 * C2), 1, 2 * C2)    # (1, heads, 2*2) flattened

    # One-time host-side packing of all edge-structure constants + weights.
    static_slab = build_static_slab(w1, att1, w2, att2)

    out = jax.block_until_ready(gat_forward(static_slab, x))

    # Reference check (literal mirror of the torch module).
    base = np.repeat(np.arange(10, dtype=np.int32).reshape(10, 1), num_nodes, axis=1)
    edge = jnp.asarray(np.concatenate([base, (base + 10) % 10], axis=0))   # (20, N)
    ref = jax.block_until_ready(_gat_ref(x, edge, w1, att1, w2, att2))

    assert out.shape == (num_nodes, 2) and out.dtype == jnp.float32
    assert np.allclose(np.asarray(out), np.asarray(ref), rtol=1e-3, atol=1e-3)
    print("KERNEL_OK")
</pallas_src>

<mosaic_0001>
module attributes {stable_mosaic.version = 11 : i64} {
  func.func @gat_kernel(%arg0: memref<68x40xf32, #tpu.memory_space<vmem>>, %arg1: memref<10x20xf32, #tpu.memory_space<vmem>>, %arg2: memref<2x20xf32, #tpu.memory_space<vmem>>) attributes {dimension_semantics = [], scalar_prefetch = 0 : i64, scratch_operands = 0 : i64, tpu.core_type = #tpu.core_type<tc>} {
    %c0 = arith.constant 0 : index
    %c0_0 = arith.constant 0 : index
    %0 = vector.load %arg0[%c0, %c0_0] : memref<68x40xf32, #tpu.memory_space<vmem>>, vector<20x40xf32>
    %c24 = arith.constant 24 : index
    %c0_1 = arith.constant 0 : index
    %1 = vector.load %arg0[%c24, %c0_1] : memref<68x40xf32, #tpu.memory_space<vmem>>, vector<20x20xf32>
    %c48 = arith.constant 48 : index
    %c0_2 = arith.constant 0 : index
    %2 = vector.load %arg0[%c48, %c0_2] : memref<68x40xf32, #tpu.memory_space<vmem>>, vector<10x10xf32>
    %c64 = arith.constant 64 : index
    %c0_3 = arith.constant 0 : index
    %3 = vector.load %arg0[%c64, %c0_3] : memref<68x40xf32, #tpu.memory_space<vmem>>, vector<4x8xf32>
    %c0_4 = arith.constant 0 : index
    %c0_5 = arith.constant 0 : index
    %4 = vector.load %arg1[%c0_4, %c0_5] : memref<10x20xf32, #tpu.memory_space<vmem>>, vector<10x20xf32>
    %cst = arith.constant dense<0.000000e+00> : vector<10x20xf32>
    %5 = tpu.matmul %2, %4, %cst {dimension_numbers = #tpu.dot_dimension_numbers<[1], [0], [0], [1], [0, 0, 1, 1], [], []>} : vector<10x10xf32>, vector<10x20xf32>, vector<10x20xf32> -> vector<10x20xf32>
    %cst_6 = arith.constant dense<0.000000e+00> : vector<10x40xf32>
    %6 = tpu.matmul %5, %0, %cst_6 {dimension_numbers = #tpu.dot_dimension_numbers<[1], [0], [0], [1], [0, 0, 1, 1], [], []>} : vector<10x20xf32>, vector<20x40xf32>, vector<10x40xf32> -> vector<10x40xf32>
    %7 = vector.extract_strided_slice %6 {offsets = [0, 20], sizes = [8, 20], strides = [1, 1]} : vector<10x40xf32> to vector<8x20xf32>
    %8 = vector.extract_strided_slice %6 {offsets = [8, 0], sizes = [1, 20], strides = [1, 1]} : vector<10x40xf32> to vector<1x20xf32>
    %9 = vector.extract_strided_slice %6 {offsets = [9, 20], sizes = [1, 20], strides = [1, 1]} : vector<10x40xf32> to vector<1x20xf32>
    %10 = arith.addf %8, %9 : vector<1x20xf32>
    %cst_7 = arith.constant 0.000000e+00 : f32
    %11 = vector.broadcast %cst_7 : f32 to vector<1x20xf32>
    %12 = arith.cmpf ogt, %10, %11 : vector<1x20xf32>
    %cst_8 = arith.constant 2.000000e-01 : f32
    %13 = vector.broadcast %cst_8 : f32 to vector<1x20xf32>
    %14 = arith.mulf %13, %10 : vector<1x20xf32>
    %15 = arith.select %12, %10, %14 : vector<1x20xi1>, vector<1x20xf32>
    %cst_9 = arith.constant dense<0xFF800000> : vector<1xf32>
    %16 = vector.multi_reduction <maximumf>, %15, %cst_9 [1] : vector<1x20xf32> to vector<1xf32>
    %17 = vector.shape_cast %16 : vector<1xf32> to vector<1x1xf32>
    %18 = vector.broadcast %17 : vector<1x1xf32> to vector<1x20xf32>
    %19 = arith.subf %15, %18 : vector<1x20xf32>
    %20 = math.exp %19 : vector<1x20xf32>
    %cst_10 = arith.constant dense<0.000000e+00> : vector<1xf32>
    %21 = vector.multi_reduction <add>, %20, %cst_10 [1] : vector<1x20xf32> to vector<1xf32>
    %22 = vector.shape_cast %21 : vector<1xf32> to vector<1x1xf32>
    %23 = vector.broadcast %22 : vector<1x1xf32> to vector<1x20xf32>
    %24 = arith.divf %20, %23 : vector<1x20xf32>
    %25 = vector.broadcast %24 : vector<1x20xf32> to vector<8x20xf32>
    %26 = arith.mulf %7, %25 : vector<8x20xf32>
    %cst_11 = arith.constant dense<0.000000e+00> : vector<8x20xf32>
    %27 = tpu.matmul %26, %1, %cst_11 {dimension_numbers = #tpu.dot_dimension_numbers<[1], [0], [0], [1], [0, 0, 1, 1], [], []>} : vector<8x20xf32>, vector<20x20xf32>, vector<8x20xf32> -> vector<8x20xf32>
    %cst_12 = arith.constant 0.000000e+00 : f32
    %28 = vector.broadcast %cst_12 : f32 to vector<8x20xf32>
    %29 = arith.maximumf %27, %28 : vector<8x20xf32>
    %cst_13 = arith.constant dense<0.000000e+00> : vector<4x20xf32>
    %30 = tpu.matmul %3, %29, %cst_13 {dimension_numbers = #tpu.dot_dimension_numbers<[1], [0], [0], [1], [0, 0, 1, 1], [], []>} : vector<4x8xf32>, vector<8x20xf32>, vector<4x20xf32> -> vector<4x20xf32>
    %cst_14 = arith.constant dense<0.000000e+00> : vector<4x40xf32>
    %31 = tpu.matmul %30, %0, %cst_14 {dimension_numbers = #tpu.dot_dimension_numbers<[1], [0], [0], [1], [0, 0, 1, 1], [], []>} : vector<4x20xf32>, vector<20x40xf32>, vector<4x40xf32> -> vector<4x40xf32>
    %32 = vector.extract_strided_slice %31 {offsets = [0, 20], sizes = [2, 20], strides = [1, 1]} : vector<4x40xf32> to vector<2x20xf32>
    %33 = vector.extract_strided_slice %31 {offsets = [2, 0], sizes = [1, 20], strides = [1, 1]} : vector<4x40xf32> to vector<1x20xf32>
    %34 = vector.extract_strided_slice %31 {offsets = [3, 20], sizes = [1, 20], strides = [1, 1]} : vector<4x40xf32> to vector<1x20xf32>
    %35 = arith.addf %33, %34 : vector<1x20xf32>
    %cst_15 = arith.constant 0.000000e+00 : f32
    %36 = vector.broadcast %cst_15 : f32 to vector<1x20xf32>
    %37 = arith.cmpf ogt, %35, %36 : vector<1x20xf32>
    %cst_16 = arith.constant 2.000000e-01 : f32
    %38 = vector.broadcast %cst_16 : f32 to vector<1x20xf32>
    %39 = arith.mulf %38, %35 : vector<1x20xf32>
    %40 = arith.select %37, %35, %39 : vector<1x20xi1>, vector<1x20xf32>
    %cst_17 = arith.constant dense<0xFF800000> : vector<1xf32>
    %41 = vector.multi_reduction <maximumf>, %40, %cst_17 [1] : vector<1x20xf32> to vector<1xf32>
    %42 = vector.shape_cast %41 : vector<1xf32> to vector<1x1xf32>
    %43 = vector.broadcast %42 : vector<1x1xf32> to vector<1x20xf32>
    %44 = arith.subf %40, %43 : vector<1x20xf32>
    %45 = math.exp %44 : vector<1x20xf32>
    %cst_18 = arith.constant dense<0.000000e+00> : vector<1xf32>
    %46 = vector.multi_reduction <add>, %45, %cst_18 [1] : vector<1x20xf32> to vector<1xf32>
    %47 = vector.shape_cast %46 : vector<1xf32> to vector<1x1xf32>
    %48 = vector.broadcast %47 : vector<1x1xf32> to vector<1x20xf32>
    %49 = arith.divf %45, %48 : vector<1x20xf32>
    %50 = vector.broadcast %49 : vector<1x20xf32> to vector<2x20xf32>
    %51 = arith.mulf %32, %50 : vector<2x20xf32>
    %cst_19 = arith.constant dense<0.000000e+00> : vector<2x20xf32>
    %52 = tpu.matmul %51, %1, %cst_19 {dimension_numbers = #tpu.dot_dimension_numbers<[1], [0], [0], [1], [0, 0, 1, 1], [], []>} : vector<2x20xf32>, vector<20x20xf32>, vector<2x20xf32> -> vector<2x20xf32>
    %cst_20 = arith.constant dense<0xFF800000> : vector<20xf32>
    %53 = vector.multi_reduction <maximumf>, %52, %cst_20 [0] : vector<2x20xf32> to vector<20xf32>
    %54 = vector.shape_cast %53 : vector<20xf32> to vector<1x20xf32>
    %55 = vector.broadcast %54 : vector<1x20xf32> to vector<2x20xf32>
    %56 = arith.subf %52, %55 : vector<2x20xf32>
    %57 = math.exp %56 : vector<2x20xf32>
    %cst_21 = arith.constant dense<0.000000e+00> : vector<20xf32>
    %58 = vector.multi_reduction <add>, %57, %cst_21 [0] : vector<2x20xf32> to vector<20xf32>
    %59 = vector.shape_cast %58 : vector<20xf32> to vector<1x20xf32>
    %60 = math.log %59 : vector<1x20xf32>
    %61 = vector.broadcast %60 : vector<1x20xf32> to vector<2x20xf32>
    %62 = arith.subf %56, %61 : vector<2x20xf32>
    %c0_22 = arith.constant 0 : index
    %c0_23 = arith.constant 0 : index
    %63 = vector.load %arg2[%c0_22, %c0_23] : memref<2x20xf32, #tpu.memory_space<vmem>>, vector<2x20xf32>
    tpu.vector_store %arg2[%c0_22, %c0_23], %62 {strides = array<i32>} : memref<2x20xf32, #tpu.memory_space<vmem>>, vector<2x20xf32>,
    return
  }
}

</mosaic_0001>

<bundles_post_ra>
// kernel: gat_forward.1
= control target key start
LH: loop header
LB: loop body
LE: loop exit
PB: predicated region body
PF: predicated region fallthrough
CT: control target
= control target key end

     0   :  { %vm30_vm0 = vcmask 1041408   ;;  %vm23_vm1 = vcmask 80896   ;;  %vm116_vm2 = vcmask 1043456   ;;  %s808_s0 = inlined_call_operand.vmem [shape: f32[68,40], index: 0, kind: input, shape index: {}]   ;;  %s809_s1 = inlined_call_operand.vmem [shape: f32[10,20], index: 1, kind: input, shape index: {}]   ;;  %s810_s2 = inlined_call_operand.hbm [shape: f32[2,20], index: 2, kind: output, shape index: {}]  }
   0x1   :  { %v22_v0 = vld [vmem:[%s809_s1 + $0x8] sm:$0x3]  ;;  %v21_v1 = vld [vmem:[%s809_s1] sm:$0xff]  ;;  %v18_v2 = vld [vmem:[%s808_s0 + $0x30] sm:$0xff] }
   0x2   :  { %628 = vmatprep.subr.msk.mxu0 %vm30_vm0, %v22_v0  ;;  %632 = vmatprep.mubr.msk.f32.mxu0 %vm23_vm1, %v18_v2  ;;  %v747_v3 = vld [vmem:[%s808_s0 + $0x10] sm:$0xf]  ;;  %v19_v4 = vld [vmem:[%s808_s0 + $0x38] sm:$0x3] }
   0x3   :  { %629 = vmatpush3.msk.msra.mxu0 %vm30_vm0, %v22_v0  ;;  %635 = vmatprep.subr.msk.mxu1 %vm116_vm2, %v747_v3 }
   0x4   :  { %7 = vsyncpa [#allocation3], 0  ;;  %630 = vmatprep.subr.mxu0 %v21_v1  ;;  %636 = vmatpush3.msk.msra.mxu1 %vm116_vm2, %v747_v3  ;;  %v759_v5 = vld [vmem:[%s808_s0 + $0x8] sm:$0xff]  ;;  %v12_v6 = vld [vmem:[%s808_s0] sm:$0xff]  ;;  %vm109_vm3 = vcmask 162816   ;;  %s715_s22 = smov 108   ;;  %v216_v22 = vlaneseq }
   0x5   :  { %631 = vmatpush3.msra.mxu0 %v21_v1  ;;  %637 = vmatprep.subr.mxu1 %v759_v5  ;;  %vm204_vm5 = vcmask 155648   ;;  %v17_v23 = vld [vmem:[%s808_s0 + $0x28] sm:$0xf]  ;;  %v716_v25 = vmov 0.0   ;;  %v16_v26 = vld [vmem:[%s808_s0 + $0x20] sm:$0xff]  ;;  %vm717_vm6 = vmmov 0  }
   0x6   :  { %633 = vmatmul.mubr.msk.f32.vlgmr.msra.gmra.mxu0 %vm23_vm1, %v19_v4  ;;  %638 = vmatpush3.msra.mxu1 %v759_v5  ;;  %v772_v24 = vshrl.u32 %v216_v22, 7  ;;  %v15_v27 = vld [vmem:[%s808_s0 + $0x18] sm:$0xff]  ;;  %s718_s29 = smov 20   ;;  %v20_v38 = vld [vmem:[%s808_s0 + $0x40] sm:$0xf]  ;;  %vm304_vm7 = vcmask 64512  }
   0x7   :  { %639 = vmatprep.subr.mxu1 %v12_v6  ;;  %644 = vmatprep.subr.mxu0 %v716_v25  ;;  %vm460_vm9 = vcmask 157698   ;;  %vm556_vm10 = vcmask 156672   ;;  %s719_s0 = smov [#allocation2]  }
   0x8   :  { %640 = vmatpush3.msra.mxu1 %v12_v6  ;;  %650 = vmatprep.mubr.msk.f32.mxu0 %vm717_vm6, %v716_v25  ;;  %v218_v28 = vsub.s32 0, %v772_v24  ;;  %v474_v56 = vsub.s32 2, %v772_v24  ;;  %s584_s4 = sshll.u32 %s719_s0, 4  ;;  %s585_s4 = int_to_ptr.vmem [resolvable:$true] %s584_s4 }
   0x9   :  { %645 = vmatpush3.msk.msra.mxu0 %vm116_vm2, %v17_v23  ;;  %653 = vmatprep.subr.mxu1 %v716_v25  ;;  %s693_s5 = scalar_lea.vmem %s585_s4, 32  ;;  %p698_p1 = scmp.lt.s32.totalorder %s585_s4, %s585_s4 }
   0xa   :  { %646 = vmatprep.subr.mxu0 %v716_v25  ;;  %p694_p0 = scmp.ne.s32.totalorder %s585_s4, %s693_s5  ;;  %p699_p2 = scmp.lt.s32.totalorder %s693_s5, %s693_s5 }
   0xb   :  { %647 = vmatpush3.msra.mxu0 %v16_v26 }
   0xc   :  { %648 = vmatprep.subr.mxu0 %v716_v25  ;;  %p700_p3 = por %p699_p2, %p698_p1 }
   0xd   :  { %649 = vmatpush3.msra.mxu0 %v15_v27 }
   0xe   :  { %658 = vmatprep.subr.mxu0 %v716_v25  ;;  %p701_p4 = pnand %p700_p3, %p694_p0 }
  0xc6   :  { %v634_v7 = vpop.f32.mrf.mxu0 }
  0xc8   :  { %v100_v8 = vpop.f32.mrf.mxu0 }
  0xc9   :  { %641 = vmatprep.mubr.msk.f32.mxu1 %vm109_vm3, %v100_v8 }
  0xca   :  { %642 = vmatmul.mubr.msk.f32.vlgmr.msra.gmra.mxu1 %vm109_vm3, %v634_v7 }
  0xcb   :  { %655 = vmatprep.mubr.msk.f32.mxu1 %vm717_vm6, %v716_v25 }
 0x18a   :  { %v643_v9 = vpop.f32.mrf.mxu1 }
 0x18b   :  { %v196_v10 = vrot.slane %v643_v9, 1 }
 0x18c   :  { %v186_v32 = vpop.f32.mrf.mxu1 }
 0x18d   :  { %197 = vrot.lane.b32.xlu0 %v196_v10, %s715_s22 }
 0x1ff   :  { %v198_v11 = vpop.permute.xlu0 %197 }
 0x200   :  { %v200_v12 = vadd.f32 %v643_v9, %v198_v11 }
 0x202   :  { %v202_v13 = vmul.f32 0.2, %v200_v12  ;;  %vm201_vm4 = vcmp.gt.f32.partialorder %v200_v12, 0.0 }
 0x204   :  { %v203_v14 = vsel %vm201_vm4, %v200_v12, %v202_v13 }
 0x205   :  { %v205_v15 = vsel %vm204_vm5, %v203_v14, -inf }
 0x206   :  { %206 = vmax.xlane.f32.xlu0 %v205_v15 }
 0x28f   :  { %v207_v16 = vpop.xlane.xlu0 %206 }
 0x290   :  { %v208_v17 = vsub.f32 %v203_v14, %v207_v16 }
 0x292   :  { %v209_v18 = vmul.f32 1.442695, %v208_v17 }
 0x294   :  { %681 = vpow2.f32 %v209_v18 }
 0x2a1   :  { %v682_v19 = vpop.eup %681 }
 0x2a2   :  { %v211_v20 = vsel %vm204_vm5, %v682_v19, 0.0 }
 0x2a3   :  { %212 = vadd.xlane.f32.xlu1 %v211_v20 }
 0x32c   :  { %v213_v21 = vpop.xlane.xlu1 %212 }
 0x32d   :  { %683 = vrcp.f32 %v213_v21 }
 0x33a   :  { %v684_v29 = vpop.eup %683 }
 0x33b   :  { %v215_v30 = vmul.f32 %v684_v29, %v682_v19 }
 0x33d   :  { %v219_v31 = vrot.slane %v215_v30, %v218_v28 }
 0x33f   :  { %221 = vrot.lane.b32.xlu1 %v219_v31, %s718_s29 }
 0x3b1   :  { %v222_v33 = vpop.permute.xlu1 %221 }
 0x3b2   :  { %v224_v34 = vmul.f32 %v222_v33, %v186_v32 }
 0x3b4   :  { %226 = vrot.lane.b32.xlu1 %v224_v34, %s715_s22 }
 0x426   :  { %v227_v35 = vpop.permute.xlu1 %226 }
 0x427   :  { %651 = vmatmul.mubr.msk.f32.vlgmr.msra.gmra.mxu0 %vm109_vm3, %v227_v35 }
 0x428   :  { %659 = vmatpush3.msk.msra.mxu0 %vm116_vm2, %v747_v3  ;;  %664 = vmatprep.mubr.msk.f32.mxu0 %vm717_vm6, %v716_v25 }
 0x429   :  { %660 = vmatprep.subr.mxu0 %v716_v25 }
 0x42a   :  { %661 = vmatpush3.msra.mxu0 %v759_v5 }
 0x42b   :  { %662 = vmatprep.subr.mxu0 %v716_v25 }
 0x42c   :  { %663 = vmatpush3.msra.mxu0 %v12_v6 }
 0x4e7   :  { %v299_v36 = vpop.f32.mrf.mxu0 }
 0x4e8   :  { %v303_v37 = vmax.f32 %v299_v36, 0.0 }
 0x4e9   :  { %v652_v39 = vpop.f32.mrf.mxu0 }
 0x4ea   :  { %654 = vmatpush3.msra.mxu1 %v303_v37 }
 0x4eb   :  { %656 = vmatmul.mubr.msk.f32.vlgmr.msra.gmra.mxu1 %vm304_vm7, %v20_v38  ;;  %667 = vmatprep.subr.mxu1 %v716_v25 }
 0x4ec   :  { %668 = vmatpush3.msk.msra.mxu1 %vm116_vm2, %v17_v23  ;;  %673 = vmatprep.mubr.msk.f32.mxu1 %vm717_vm6, %v716_v25 }
 0x4ed   :  { %669 = vmatprep.subr.mxu1 %v716_v25 }
 0x4ee   :  { %670 = vmatpush3.msra.mxu1 %v16_v26 }
 0x4ef   :  { %671 = vmatprep.subr.mxu1 %v716_v25 }
 0x4f0   :  { %672 = vmatpush3.msra.mxu1 %v15_v27 }
 0x5ab   :  { %v374_v40 = vpop.f32.mrf.mxu1 }
 0x5ac   :  { %665 = vmatmul.mubr.msk.f32.vlgmr.msra.gmra.mxu0 %vm109_vm3, %v374_v40 }
 0x5ad   :  { %v657_v41 = vpop.f32.mrf.mxu1 }
 0x66c   :  { %v447_v42 = vpop.f32.mrf.mxu0 }
 0x66d   :  { %v452_v43 = vrot.slane %v447_v42, 1 }
 0x66e   :  { %v666_v44 = vpop.f32.mrf.mxu0 }
 0x66f   :  { %453 = vrot.lane.b32.xlu1 %v452_v43, %s715_s22 }
 0x6e1   :  { %v454_v45 = vpop.permute.xlu1 %453 }
 0x6e2   :  { %v456_v46 = vadd.f32 %v454_v45, %v447_v42 }
 0x6e4   :  { %v458_v47 = vmul.f32 0.2, %v456_v46  ;;  %vm457_vm8 = vcmp.gt.f32.partialorder %v456_v46, 0.0 }
 0x6e6   :  { %v459_v48 = vsel %vm457_vm8, %v456_v46, %v458_v47 }
 0x6e7   :  { %v461_v49 = vsel %vm460_vm9, %v459_v48, -inf }
 0x6e8   :  { %462 = vmax.xlane.f32.xlu1 %v461_v49 }
 0x771   :  { %v463_v50 = vpop.xlane.xlu1 %462 }
 0x772   :  { %v464_v51 = vsub.f32 %v459_v48, %v463_v50 }
 0x774   :  { %v465_v52 = vmul.f32 1.442695, %v464_v51 }
 0x776   :  { %685 = vpow2.f32 %v465_v52 }
 0x783   :  { %v686_v53 = vpop.eup %685 }
 0x784   :  { %v467_v54 = vsel %vm460_vm9, %v686_v53, 0.0 }
 0x785   :  { %468 = vadd.xlane.f32.xlu0 %v467_v54 }
 0x80e   :  { %v469_v55 = vpop.xlane.xlu0 %468 }
 0x80f   :  { %687 = vrcp.f32 %v469_v55 }
 0x81c   :  { %v688_v57 = vpop.eup %687 }
 0x81d   :  { %v471_v58 = vmul.f32 %v688_v57, %v686_v53 }
 0x81f   :  { %v475_v59 = vrot.slane %v471_v58, %v474_v56 }
 0x821   :  { %477 = vrot.lane.b32.xlu0 %v475_v59, %s718_s29 }
 0x893   :  { %v478_v60 = vpop.permute.xlu0 %477 }
 0x894   :  { %v480_v61 = vmul.f32 %v478_v60, %v447_v42 }
 0x896   :  { %482 = vrot.lane.b32.xlu0 %v480_v61, %s715_s22 }
 0x908   :  { %v483_v62 = vpop.permute.xlu0 %482 }
 0x909   :  { %674 = vmatmul.mubr.msk.f32.vlgmr.msra.gmra.mxu1 %vm109_vm3, %v483_v62 }
 0x9c9   :  { %v552_v63 = vpop.f32.mrf.mxu1 }
 0x9ca   :  { %v557_v0 = vsel %vm556_vm10, %v552_v63, -inf }
 0x9cb   :  { %v558_v1 = vrot.slane %v557_v0, 4  ;;  %v675_v2 = vpop.f32.mrf.mxu1 }
 0x9cd   :  { %v559_v3 = vmax.f32 %v557_v0, %v558_v1 }
 0x9cf   :  { %v560_v4 = vrot.slane %v559_v3, 2 }
 0x9d1   :  { %v561_v5 = vmax.f32 %v559_v3, %v560_v4 }
 0x9d3   :  { %v562_v6 = vrot.slane %v561_v5, 1 }
 0x9d5   :  { %v563_v7 = vmax.f32 %v561_v5, %v562_v6 }
 0x9d7   :  { %v564_v8 = vsub.f32 %v552_v63, %v563_v7 }
 0x9d9   :  { %v565_v9 = vmul.f32 1.442695, %v564_v8 }
 0x9db   :  { %689 = vpow2.f32 %v565_v9 }
 0x9e8   :  { %v690_v10 = vpop.eup %689 }
 0x9e9   :  { %v567_v11 = vsel %vm556_vm10, %v690_v10, 0.0 }
 0x9ea   :  { %v568_v12 = vrot.slane %v567_v11, 4 }
 0x9ec   :  { %v569_v13 = vadd.f32 %v568_v12, %v567_v11 }
 0x9ee   :  { %v570_v14 = vrot.slane %v569_v13, 2 }
 0x9f0   :  { %v571_v15 = vadd.f32 %v570_v14, %v569_v13 }
 0x9f2   :  { %v572_v16 = vrot.slane %v571_v15, 1 }
 0x9f4   :  { %v573_v17 = vadd.f32 %v572_v16, %v571_v15 }
 0x9f6   :  { %691 = vlog2.f32 %v573_v17 }
 0xa03   :  { %v692_v18 = vpop.eup %691 }
 0xa04   :  { %v575_v19 = vmul.f32 0.6931472, %v692_v18 }
 0xa06   :  { %v576_v20 = vsub.f32 %v564_v8, %v575_v19 }
 0xa08   :  { %577 = vst.msk [vmem:[#allocation2] sm:$0x3] %vm556_vm10, %v576_v20 }
 0xa09   :  { %704 = shalt.err (!%p701_p4)
}
 0xa0a   :  { %587 = dma.vmem_to_hbm [thread:$0]  %s585_s4, 32, %s810_s2, [#allocation3]  }
 0xa0b   :  { %713 = dma.done.wait [#allocation3], 32  }
 0xa0c   :  { %714 = vsyncadd [#allocation3], 4294967264 }
 0xa0d   :  { %591 = vsyncpa [#allocation3], 1 }

</bundles_post_ra>
